<compile_context>
chip_gen: v5e
topology: v5e:2x2
jax: 0.10.0
libtpu: 0.0.40
codegen_flags: <defaults>
</compile_context>

<pallas_src>
import math

import jax
import jax.numpy as jnp
from jax.experimental import pallas as pl
from jax.experimental.pallas import tpu as pltpu


def _drop_path_kernel(scale_ref, x_ref, o_ref):
    # scale_ref: (B,) f32 in SMEM (scalar prefetch). One grid step handles one
    # (1, TR, LANE) tile of sample b; the whole tile is scaled by that
    # sample's 0 or 1/keep_prob factor. Multiply in f32, cast on store.
    b = pl.program_id(0)
    scale = scale_ref[b]
    o_ref[...] = (x_ref[...].astype(jnp.float32) * scale).astype(o_ref.dtype)


def _pick_lane(n):
    """Largest lane width (multiple of 128) that divides n."""
    for cand in (4096, 2048, 1024, 512, 256, 128):
        if n % cand == 0:
            return cand
    # TODO(synk): pad N up to a multiple of 128 for lane-dense stores when the
    # per-sample element count is not 128-divisible (masked vst fallback here;
    # block equals the full trailing dims so it still compiles correctly).
    return n


def _pick_tile_rows(r, lane, bytes_per):
    """Rows per block: divisor of r, prefer multiples of 8, ~<=2 MiB/block."""
    per_block_budget = 2 * 1024 * 1024  # bytes per pipeline buffer
    max_tr = max(1, per_block_budget // (lane * bytes_per))
    if r <= max_tr:
        return r
    best_any, best_mult8 = 1, None
    for d in range(min(r, max_tr), 0, -1):
        if r % d == 0:
            if best_any == 1:
                best_any = d
            if d % 8 == 0:
                best_mult8 = d
                break
    return best_mult8 if best_mult8 is not None else best_any


def drop_path_pallas(x, drop_prob: float = 0.0, training: bool = False, key=None):
    """Pallas TPU implementation of timm-style drop_path (per-sample)."""
    if drop_prob == 0.0 or not training:
        return x
    keep_prob = 1.0 - float(drop_prob)
    if key is None:
        key = jax.random.PRNGKey(0)

    orig_shape = x.shape
    B = x.shape[0]
    N = int(math.prod(x.shape[1:]))

    # Per-sample random keep/drop scale computed in the wrapper (timm recipe).
    u = jax.random.uniform(key, (B,), dtype=jnp.float32)
    scale = jnp.floor(jnp.float32(keep_prob) + u) / jnp.float32(keep_prob)

    # Lane-dense per-sample layout: (B, R, LANE), LANE a multiple of 128.
    lane = _pick_lane(N)
    R = N // lane
    xr = x.reshape(B, R, lane)  # contiguous reshape: metadata only, no copy

    bytes_per = int(jnp.dtype(x.dtype).itemsize)
    tr = _pick_tile_rows(R, lane, bytes_per)
    grid = (B, R // tr)

    out = pl.pallas_call(
        _drop_path_kernel,
        out_shape=jax.ShapeDtypeStruct(xr.shape, x.dtype),
        grid_spec=pltpu.PrefetchScalarGridSpec(
            num_scalar_prefetch=1,
            grid=grid,
            in_specs=[pl.BlockSpec((1, tr, lane), lambda b, r, scale: (b, r, 0))],
            out_specs=pl.BlockSpec((1, tr, lane), lambda b, r, scale: (b, r, 0)),
        ),
        compiler_params=pltpu.CompilerParams(
            dimension_semantics=("parallel", "parallel"),
            vmem_limit_bytes=32 * 1024 * 1024,
        ),
    )(scale, xr)
    return out.reshape(orig_shape)


class DropPath:
    """Mirror of the PyTorch DropPath module (forward only)."""

    def __init__(self, drop_prob=None):
        self.drop_prob = 0.0 if drop_prob is None else float(drop_prob)
        self.training = True

    def __call__(self, x, key=None):
        return drop_path_pallas(x, self.drop_prob, self.training, key=key)


if __name__ == "__main__":
    key = jax.random.PRNGKey(0)
    B, L, C = 2, 8, 32
    x = jax.random.normal(key, (B, L, C), dtype=jnp.float32)

    # training mode with non-zero drop prob -> kernel path
    module = DropPath(drop_prob=0.25)
    y = module(x, key=jax.random.PRNGKey(123))
    y = jax.block_until_ready(y)

    # sanity: each sample is either exactly zero or (to f32 rounding) x / keep_prob
    keep_prob = 1.0 - 0.25
    ok = True
    for b in range(B):
        yb = y[b]
        is_zero = bool(jnp.all(yb == 0.0))
        is_scaled = bool(jnp.allclose(yb, x[b] / keep_prob, rtol=1e-6, atol=1e-6))
        ok = ok and (is_zero or is_scaled)

    # eval mode / zero drop prob -> identity
    module.training = False
    y_eval = jax.block_until_ready(module(x))
    ok = ok and bool(jnp.array_equal(y_eval, x))

    assert ok, "DropPath Pallas kernel produced unexpected values"
    print("KERNEL_OK")
</pallas_src>

<mosaic_0001>
module attributes {stable_mosaic.version = 11 : i64} {
  func.func @_drop_path_kernel(%arg0: i32, %arg1: i32, %arg2: memref<2xf32, #tpu.memory_space<smem>>, %arg3: memref<1x1x256xf32, #tpu.memory_space<vmem>>, %arg4: memref<1x1x256xf32, #tpu.memory_space<vmem>>) attributes {dimension_semantics = [#tpu.dimension_semantics<parallel>, #tpu.dimension_semantics<parallel>], iteration_bounds = array<i64: 2, 1>, scalar_prefetch = 1 : i64, scratch_operands = 0 : i64, tpu.core_type = #tpu.core_type<tc>, window_params = [{transform_indices = @transform_0, window_bounds = array<i64: 1, 1, 256>}, {transform_indices = @transform_1, window_bounds = array<i64: 1, 1, 256>}]} {
    %0 = arith.index_cast %arg0 : i32 to index
    %1 = memref.load %arg2[%0] : memref<2xf32, #tpu.memory_space<smem>>
    %c0 = arith.constant 0 : index
    %c0_0 = arith.constant 0 : index
    %c0_1 = arith.constant 0 : index
    %2 = vector.load %arg3[%c0, %c0_0, %c0_1] : memref<1x1x256xf32, #tpu.memory_space<vmem>>, vector<1x1x256xf32>
    %3 = vector.broadcast %1 : f32 to vector<1x1x256xf32>
    %4 = arith.mulf %2, %3 : vector<1x1x256xf32>
    %c0_2 = arith.constant 0 : index
    %c0_3 = arith.constant 0 : index
    %c0_4 = arith.constant 0 : index
    %5 = vector.load %arg4[%c0_2, %c0_3, %c0_4] : memref<1x1x256xf32, #tpu.memory_space<vmem>>, vector<1x1x256xf32>
    tpu.vector_store %arg4[%c0_2, %c0_3, %c0_4], %4 {strides = array<i32>} : memref<1x1x256xf32, #tpu.memory_space<vmem>>, vector<1x1x256xf32>,
    return
  }
  func.func @transform_0(%arg0: i32, %arg1: i32, %arg2: memref<2xf32, #tpu.memory_space<smem>>) -> (i32, i32, i32) {
    %c0_i32 = arith.constant 0 : i32
    %c0_i32_0 = arith.constant 0 : i32
    return %arg0, %arg1, %c0_i32 : i32, i32, i32
  }
  func.func @transform_1(%arg0: i32, %arg1: i32, %arg2: memref<2xf32, #tpu.memory_space<smem>>) -> (i32, i32, i32) {
    %c0_i32 = arith.constant 0 : i32
    %c0_i32_0 = arith.constant 0 : i32
    return %arg0, %arg1, %c0_i32 : i32, i32, i32
  }
}

</mosaic_0001>

<bundles_post_ra>
// kernel: tpu_custom_call.1
= control target key start
LH: loop header
LB: loop body
LE: loop exit
PB: predicated region body
PF: predicated region fallthrough
CT: control target
= control target key end

     0   :  { %s474_s12 = smov [#allocation3]   ;;  %s614_s0 = inlined_call_operand.hbm [shape: f32[2], index: 0, kind: input, shape index: {}]   ;;  %s615_s1 = inlined_call_operand.hbm [shape: f32[2,1,256], index: 1, kind: input, shape index: {}]   ;;  %s616_s2 = inlined_call_operand.hbm [shape: f32[2,1,256], index: 2, kind: output, shape index: {}]  }
   0x1   :  { %s8_s11 = sshll.u32 %s614_s0, 4  ;;  %s9_s11 = int_to_ptr.hbm [resolvable:$true] %s8_s11 }
   0x2   :  { %11 = dma.hbm_to_smem %s9_s11, 16, %s474_s12, [#allocation2] }
   0x3   :  { %440 = dma.done.wait [#allocation2], 16 }
   0x4   :  { %441 = vsyncadd [#allocation2], 4294967280 }
   0x5   :  { %14 = sfence }
   0x6   :  { %15 = vsyncpa [#allocation5], 0 }
   0x7   :  { %17 = vsyncpa [#allocation5 + $0x1], 0 }
   0x8   :  { %18 = vsyncpa [#allocation6], 0 }
   0x9   :  { %20 = vsyncpa [#allocation6 + $0x1], 0  ;;  %s493_s13 = smov 0   ;;  %s495_s14 = smov 0  }
   0xa   :  { %s497_s15 = smov 0   ;;  %s499_s16 = smov 0  }
   0xb   :  { %s501_s17 = smov 0   ;;  %s503_s0 = smov 0  }
   0xc LB: > { %s270_s18 = sadd.s32 4294967295, %s472_s0   ;;  %s271_s19 = sadd.s32 4294967294, %s472_s0   ;;  %s472_s0 = sphi %s503_s0, %s26_s0   ;;  %s468_s17 = sphi %s501_s17, %s625_s17   ;;  %s464_s16 = sphi %s499_s16, %s624_s16   ;;  %s460_s15 = sphi %s497_s15, %s623_s15   ;;  %s456_s14 = sphi %s495_s14, %s622_s14   ;;  %s452_s13 = sphi %s493_s13, %s621_s13  }
   0xd   : > { %s38_s20 = sadd.s32 1, %s468_s17  ;;  %s47_s21 = sadd.s32 1, %s460_s15 }
   0xe   : > { %p40_p0 = scmp.ge.s32.totalorder %s38_s20, 2  ;;  %p54_p1 = scmp.ne.s32.totalorder %s460_s15, %s456_s14 }
   0xf   : > { %p55_p2 = scmp.eq.s32.totalorder %s472_s0, 0  ;;  %p60_p3 = scmp.ne.s32.totalorder %s456_s14, %s452_s13 }
  0x10   : > { %s627_s20 = smov (%p40_p0, %s38_s20), 0  ;;  %p61_p5 = scmp.eq.s32.totalorder %s270_s18, 0 }
  0x11   : > { %p534_p4 = por %p55_p2, %p54_p1  ;;  %s42_s23 = ssub.s32 %s468_s17, %s627_s20 }
  0x12   : > { %p86_p6 = scmp.eq.s32.totalorder %s270_s18, 1  ;;  %p45_p7 = scmp.eq.s32.totalorder %s42_s23, 0 }
  0x13   : > { %p540_p8 = por %p61_p5, %p60_p3  ;;  %p92_p10 = scmp.eq.s32.totalorder %s271_s19, 1 }
  0x14   : > { %p544_p9 = por %p86_p6, %p54_p1  ;;  %p273_p12 = scmp.ge.s32.totalorder %s472_s0, 2 }
  0x15   : > { %s549_s26 = scalar_select %p45_p7, %s460_s15, %s47_s21  }
  0x16   : > { %p551_p11 = por %p92_p10, %p60_p3  ;;  %p295_p13 = scmp.lt.s32.totalorder %s472_s0, 2 }
  0x17   : > { %s112_s28 = sand.u32 1, %s460_s15   ;;  %s275_s30 = sshll.u32 %s468_s17, 1 }
  0x18   : > { %s274_s29 = sshll.u32 %s112_s28, 1  ;;  %s122_s5 = scalar_lea.hbm %s615_s1, %s275_s30 }
  0x19   : > { %s116_s6 = scalar_lea.vmem [#allocation4], %s274_s29  ;;  %s124_s8 = sshll.u32 %s122_s5, 4  ;;  %s125_s8 = int_to_ptr.hbm [resolvable:$true] %s124_s8 }
  0x1a   : > { %s126_s7 = sshll.u32 %s116_s6, 4  ;;  %p288_p0 = pnand %p295_p13, %p534_p4  ;;  %s127_s7 = int_to_ptr.vmem [resolvable:$true] %s126_s7 }
  0x1b   : > { %p276_p1 = scmp.ge.s32.totalorder %s472_s0, 1  ;;  %p131_p2 = scmp.lt.s32.totalorder %s472_s0, 3 }
  0x1c   : > { %s113_s9 = scalar_lea.sflag [#allocation5], %s112_s28 }
  0x1d   : > { %290 = dma.hbm_to_vmem [thread:$0]  (!%p288_p0), %s125_s8, 32, %s127_s7, %s113_s9  }
  0x1e   : > { %p132_p3 = pnand %p276_p1, %p131_p2 }
  0x1f   : > { %s567_s10 = sand.u32 (!%p132_p3), 1, %s456_s14  }
  0x20   : > { %135 = sbr.rel (%p132_p3) target bundleno = 53 (0x35), region = 24  ;;  %s277_s11 = sshll.u32 (!%p132_p3), %s567_s10, 1 }
  0x21   : > { %s138_s12 = scalar_lea.sflag (!%p132_p3), [#allocation5], %s567_s10  ;;  %s141_s18 = scalar_lea.vmem (!%p132_p3), [#allocation4], %s277_s11 }
  0x25   : > { %443 = dma.done.wait (%p540_p8), %s138_s12, 32  }
  0x26   : > { %445 = vsyncadd (%p540_p8), %s138_s12, 4294967264  ;;  %s161_s19 = sld [smem:[#allocation3 + %s464_s16]]  ;;  %s280_s21 = sshll.u32 %s464_s16, 1  ;;  %v165_v0 = vlaneseq  ;;  %v162_v1 = vld [vmem:[%s141_s18] sm:$0x3] }
  0x27   : > { %s183_s28 = scalar_lea.hbm %s616_s2, %s280_s21  ;;  %s160_s29 = scalar_lea.vmem [#allocation7], %s277_s11 }
  0x28   : > { %s185_s30 = sshll.u32 %s160_s29, 4  ;;  %s187_s3 = sshll.u32 %s183_s28, 4  ;;  %vm167_vm0 = vcmp.lt.s32.totalorder %v165_v0, 256  ;;  %s186_s30 = int_to_ptr.vmem [resolvable:$true] %s185_s30  ;;  %s188_s3 = int_to_ptr.hbm [resolvable:$true] %s187_s3 }
  0x29   : > { %s171_s24 = scalar_lea.sflag [#allocation6], %s567_s10  ;;  %s402_s4 = sshra.s32 %s188_s3, 4  ;;  %s403_s4 = int_to_ptr.hbm [resolvable:$true] %s402_s4 }
  0x2a   : > { %s404_s16 = scalar_lea.hbm %s403_s4, 2  ;;  %s408_s7 = scalar_lea.hbm %s616_s2, 4 }
  0x2b   : > { %p405_p4 = scmp.ne.s32.totalorder %s403_s4, %s404_s16  ;;  %p409_p7 = scmp.lt.s32.totalorder %s403_s4, %s616_s2 }
  0x2c   : > { %v163_v2 = vstv %s161_s19  ;;  %p410_p8 = scmp.lt.s32.totalorder %s408_s7, %s404_s16 }
  0x2d   : > { %v164_v3 = vmul.f32 %v163_v2, %v162_v1  ;;  %p406_p5 = pnand %p405_p4, %p544_p9 }
  0x2e   : > { %p411_p10 = por %p410_p8, %p409_p7 }
  0x2f   : > { %169 = vst.msk [vmem:[%s160_s29] sm:$0x3] %vm167_vm0, %v164_v3  ;;  %p407_p6 = pneg %p406_p5 }
  0x31   : > { %p412_p13 = pnand %p411_p10, %p407_p6 }
  0x33   : > { %415 = shalt.err (!%p412_p13)
}
  0x34   : > { %285 = dma.vmem_to_hbm [thread:$0]  (%p544_p9), %s186_s30, 32, %s188_s3, %s171_s24  }
  0x35 PF: > { %s199_s10 = sand.u32 1, %s452_s13   ;;  %p292_p0 = pnand %p273_p12, %p551_p11 }
  0x36   : > { %s200_s11 = scalar_lea.sflag [#allocation6], %s199_s10 }
  0x37   : > { %p293_p1 = pneg %p292_p0 }
  0x39   : > { %447 = dma.done.wait (%p293_p1), %s200_s11, 32  }
  0x3a   : > { %449 = vsyncadd (%p293_p1), %s200_s11, 4294967264  ;;  %s26_s0 = sadd.s32 1, %s472_s0   ;;  %s621_s13 = smov %s456_s14 }
  0x3b   : > { %p23_p2 = scmp.ge.s32.totalorder %s26_s0, 4   ;;  %s622_s14 = smov %s460_s15 }
  0x3c   : > { %s623_s15 = smov %s549_s26  ;;  %s624_s16 = smov %s468_s17 }
  0x3d   : > { %s625_s17 = smov %s627_s20  ;;  %25 = sbr.rel (!%p23_p2) target bundleno = 12 (0xc), region = 69 }
  0x42   :  { %206 = vsyncpa [#allocation5], 1 }
  0x43   :  { %208 = vsyncpa [#allocation5 + $0x1], 1 }
  0x44   :  { %209 = vsyncpa [#allocation6], 1 }
  0x45   :  { %211 = vsyncpa [#allocation6 + $0x1], 1 }

</bundles_post_ra>
